<compile_context>
chip_gen: v5e
topology: v5e:2x2
jax: 0.10.0
libtpu: 0.0.40
codegen_flags: <defaults>
</compile_context>

<pallas_src>
import jax
import jax.numpy as jnp
from jax.experimental import pallas as pl
from jax.experimental.pallas import tpu as pltpu


def _round_up(x, m):
    return (x + m - 1) // m * m


def _cdiv(a, b):
    return -(-a // b)


# ---------------------------------------------------------------------------
# Kernel
# ---------------------------------------------------------------------------
def relation_kernel(x1_ref, x2_ref, w12_ref, b1_ref, out_ref, x12_ref):
    dim_pad = x1_ref.shape[-1]

    # Build concat([x1, x2], dim=1) in VMEM (cheap, no HBM pass) so the fc matmul
    # is a single K = 2*dim_pad MXU pass (fills the 256-deep array on v6e/v7x).
    x12_ref[:, :dim_pad] = x1_ref[...]
    x12_ref[:, dim_pad:] = x2_ref[...]

    # fc(concat([x1, x2])): bf16 operands, f32 accumulation on the MXU.
    acc = jnp.dot(x12_ref[...], w12_ref[...], preferred_element_type=jnp.float32)

    # Epilogue entirely in f32: bias + residual + relu.
    fusion = acc + b1_ref[...] + x1_ref[...].astype(jnp.float32)
    fusion = jnp.maximum(fusion, 0.0)

    # F.normalize(fusion, dim=1): x / max(||x||_2, 1e-12) == x * rsqrt(max(sumsq, 1e-24))
    sumsq = jnp.sum(fusion * fusion, axis=1, keepdims=True)
    fusion = fusion * jax.lax.rsqrt(jnp.maximum(sumsq, 1e-24))

    out_ref[...] = fusion.astype(out_ref.dtype)


# ---------------------------------------------------------------------------
# One-time parameter prep (hoisted out of the per-call hot path)
# ---------------------------------------------------------------------------
_IO_DTYPE = jnp.bfloat16


def prepare_relation_params(w1, b1, io_dtype=_IO_DTYPE):
    """w1: PyTorch-style (dim, 2*dim) fc weight; b1: (dim,) fc bias.

    Returns a vertically stacked, pre-transposed, lane-padded weight
    [W[:, :dim].T ; W[:, dim:].T] in io_dtype (so a single K=2*dim_pad dot
    reproduces the concat-matmul) plus an f32 bias row.
    """
    dim = b1.shape[0]
    dim_pad = _round_up(dim, 128)
    w12 = jnp.zeros((2 * dim_pad, dim_pad), io_dtype)
    w12 = w12.at[:dim, :dim].set(jnp.transpose(w1[:, :dim]).astype(io_dtype))
    w12 = w12.at[dim_pad:dim_pad + dim, :dim].set(
        jnp.transpose(w1[:, dim:]).astype(io_dtype))
    b1p = jnp.zeros((1, dim_pad), jnp.float32).at[0, :dim].set(b1.astype(jnp.float32))
    return {"w12": w12, "b1": b1p, "dim": dim, "dim_pad": dim_pad,
            "io_dtype": io_dtype}


# ---------------------------------------------------------------------------
# Tile sizing: derive the batch tile from a VMEM budget, not a hard cap.
# ---------------------------------------------------------------------------
_VMEM_LIMIT_BYTES = 32 * 1024 * 1024   # safe on v5e/v6e (128 MiB phys) and v7x (64 MiB phys)
_VMEM_TILE_BUDGET = 24 * 1024 * 1024   # headroom under the explicit limit
_TILE_B_HARD_CAP = 8192


def _derive_tile_b(batch, dim_pad, io_bytes, w_bytes):
    # Per-row VMEM cost: x1/x2/out double-buffered in io_dtype, the in-kernel
    # concat scratch, and headroom for f32 epilogue temporaries.
    per_row = (3 * 2 * dim_pad * io_bytes      # x1, x2, out (double-buffered)
               + 2 * dim_pad * io_bytes        # x12 concat scratch (single-buffered)
               + 3 * dim_pad * 4)              # f32 intermediates headroom
    # Conservatively count the (resident) weights as double-buffered.
    # TODO(synk): for very large dim_pad, force single-buffered weights via
    #             pipeline_mode=pl.Buffered(1) on the weight spec.
    cap = (_VMEM_TILE_BUDGET - 2 * w_bytes) // per_row
    cap = max(8, min(_TILE_B_HARD_CAP, cap // 8 * 8))
    # Split the batch as evenly as possible so padding waste is <= one tile.
    num_tiles = _cdiv(batch, cap)
    tile_b = _round_up(_cdiv(batch, num_tiles), 8)
    return tile_b


def _pad_cast(x, rows, cols, dtype):
    r, c = x.shape
    if r == rows and c == cols and x.dtype == dtype:
        return x                               # aligned: no extra HBM pass
    return jnp.zeros((rows, cols), dtype).at[:r, :c].set(x.astype(dtype))


# ---------------------------------------------------------------------------
# Forward wrapper
# ---------------------------------------------------------------------------
def relation_forward(x1, x2, params, training=False, out_dtype=jnp.float32):
    """x1, x2: (B, dim). Returns (fusion, loss); fusion is (B, dim) in out_dtype.

    Pass out_dtype=jnp.bfloat16 to also halve the output stream if downstream
    consumers accept bf16.
    """
    dim, dim_pad = params["dim"], params["dim_pad"]
    io_dtype = params["io_dtype"]
    io_bytes = jnp.dtype(io_dtype).itemsize
    B = x1.shape[0]

    w_bytes = params["w12"].size * io_bytes + params["b1"].size * 4
    tile_b = _derive_tile_b(B, dim_pad, io_bytes, w_bytes)
    num_tiles = _cdiv(B, tile_b)
    B_pad = num_tiles * tile_b

    x1p = _pad_cast(x1, B_pad, dim_pad, io_dtype)
    x2p = _pad_cast(x2, B_pad, dim_pad, io_dtype)

    row_spec = pl.BlockSpec((tile_b, dim_pad), lambda i: (i, 0))
    w_spec = pl.BlockSpec((2 * dim_pad, dim_pad), lambda i: (0, 0))   # resident
    b_spec = pl.BlockSpec((1, dim_pad), lambda i: (0, 0))             # resident

    fusion_pad = pl.pallas_call(
        relation_kernel,
        out_shape=jax.ShapeDtypeStruct((B_pad, dim_pad), out_dtype),
        grid=(num_tiles,),
        in_specs=[row_spec, row_spec, w_spec, b_spec],
        out_specs=row_spec,
        scratch_shapes=[pltpu.VMEM((tile_b, 2 * dim_pad), io_dtype)],
        compiler_params=pltpu.CompilerParams(
            dimension_semantics=("parallel",),
            vmem_limit_bytes=_VMEM_LIMIT_BYTES),
    )(x1p, x2p, params["w12"], params["b1"])

    fusion = fusion_pad[:B, :dim]

    # TODO(synk): training loss (pre head + CrossEntropyLoss * sample_weight) is
    # host-side glue in the PyTorch module; it is not part of the inference path,
    # so loss is returned as 0 and the `pre` logits are not produced.
    loss = jnp.float32(0.0)
    return fusion, loss


if __name__ == "__main__":
    # Small shapes consistent with the module: feature dim a multiple of 128.
    B, dim, num_class = 8, 128, 8

    key = jax.random.PRNGKey(0)
    k1, k2, k3, k4, k5, k6 = jax.random.split(key, 6)

    x1 = jax.random.normal(k1, (B, dim), dtype=jnp.float32)
    x2 = jax.random.normal(k2, (B, dim), dtype=jnp.float32)

    # PyTorch linear shapes: fc.weight (dim, 2*dim), fc.bias (dim,)
    w1 = 0.05 * jax.random.normal(k3, (dim, 2 * dim), dtype=jnp.float32)
    b1 = 0.05 * jax.random.normal(k4, (dim,), dtype=jnp.float32)
    # `pre` head params exist in the module but are unused on the inference path.
    w2 = 0.05 * jax.random.normal(k5, (num_class, dim), dtype=jnp.float32)
    b2 = 0.05 * jax.random.normal(k6, (num_class,), dtype=jnp.float32)
    del w2, b2

    params = prepare_relation_params(w1, b1)
    fusion, loss = relation_forward(x1, x2, params)
    jax.block_until_ready(fusion)
    jax.block_until_ready(loss)

    # Sanity check vs. pure-JAX f32 reference (bf16 I/O -> loosened tolerance).
    ref_fusion = jnp.maximum(jnp.concatenate([x1, x2], axis=1) @ w1.T + b1 + x1, 0.0)
    ref_norm = jnp.sqrt(jnp.sum(ref_fusion * ref_fusion, axis=1, keepdims=True))
    ref_fusion = ref_fusion / jnp.maximum(ref_norm, 1e-12)

    assert fusion.shape == (B, dim)
    assert fusion.dtype == jnp.float32
    max_err = float(jnp.max(jnp.abs(fusion - ref_fusion)))
    assert max_err < 2e-2, f"mismatch vs reference: max abs err {max_err}"
    assert float(loss) == 0.0

    print("KERNEL_OK")
</pallas_src>

<mosaic_0001>
module attributes {stable_mosaic.version = 11 : i64} {
  func.func @relation_kernel(%arg0: i32, %arg1: memref<8x128xbf16, #tpu.memory_space<vmem>>, %arg2: memref<8x128xbf16, #tpu.memory_space<vmem>>, %arg3: memref<256x128xbf16, #tpu.memory_space<vmem>>, %arg4: memref<1x128xf32, #tpu.memory_space<vmem>>, %arg5: memref<8x128xf32, #tpu.memory_space<vmem>>, %arg6: memref<8x256xbf16, #tpu.memory_space<vmem>>) attributes {dimension_semantics = [#tpu.dimension_semantics<parallel>], iteration_bounds = array<i64: 1>, scalar_prefetch = 0 : i64, scratch_operands = 1 : i64, tpu.core_type = #tpu.core_type<tc>, window_params = [{transform_indices = @transform_0, window_bounds = array<i64: 8, 128>}, {transform_indices = @transform_1, window_bounds = array<i64: 8, 128>}, {pipeline_mode = #tpu.pipeline_mode<synchronous>, transform_indices = @transform_2, window_bounds = array<i64: 256, 128>}, {pipeline_mode = #tpu.pipeline_mode<synchronous>, transform_indices = @transform_3, window_bounds = array<i64: 1, 128>}, {transform_indices = @transform_4, window_bounds = array<i64: 8, 128>}]} {
    %c0 = arith.constant 0 : index
    %c0_0 = arith.constant 0 : index
    %0 = vector.load %arg1[%c0, %c0_0] : memref<8x128xbf16, #tpu.memory_space<vmem>>, vector<8x128xbf16>
    %c0_1 = arith.constant 0 : index
    %c0_2 = arith.constant 0 : index
    %1 = vector.load %arg6[%c0_1, %c0_2] : memref<8x256xbf16, #tpu.memory_space<vmem>>, vector<8x128xbf16>
    tpu.vector_store %arg6[%c0_1, %c0_2], %0 {strides = array<i32>} : memref<8x256xbf16, #tpu.memory_space<vmem>>, vector<8x128xbf16>,
    %c0_3 = arith.constant 0 : index
    %c0_4 = arith.constant 0 : index
    %2 = vector.load %arg2[%c0_3, %c0_4] : memref<8x128xbf16, #tpu.memory_space<vmem>>, vector<8x128xbf16>
    %c0_5 = arith.constant 0 : index
    %c128 = arith.constant 128 : index
    %3 = vector.load %arg6[%c0_5, %c128] : memref<8x256xbf16, #tpu.memory_space<vmem>>, vector<8x128xbf16>
    tpu.vector_store %arg6[%c0_5, %c128], %2 {strides = array<i32>} : memref<8x256xbf16, #tpu.memory_space<vmem>>, vector<8x128xbf16>,
    %c0_6 = arith.constant 0 : index
    %c0_7 = arith.constant 0 : index
    %4 = vector.load %arg6[%c0_6, %c0_7] : memref<8x256xbf16, #tpu.memory_space<vmem>>, vector<8x256xbf16>
    %c0_8 = arith.constant 0 : index
    %c0_9 = arith.constant 0 : index
    %5 = vector.load %arg3[%c0_8, %c0_9] : memref<256x128xbf16, #tpu.memory_space<vmem>>, vector<256x128xbf16>
    %cst = arith.constant dense<0.000000e+00> : vector<8x128xf32>
    %6 = tpu.matmul %4, %5, %cst {dimension_numbers = #tpu.dot_dimension_numbers<[1], [0], [0], [1], [0, 0, 1, 1], [], []>} : vector<8x256xbf16>, vector<256x128xbf16>, vector<8x128xf32> -> vector<8x128xf32>
    %c0_10 = arith.constant 0 : index
    %c0_11 = arith.constant 0 : index
    %7 = vector.load %arg4[%c0_10, %c0_11] : memref<1x128xf32, #tpu.memory_space<vmem>>, vector<1x128xf32>
    %8 = vector.broadcast %7 : vector<1x128xf32> to vector<8x128xf32>
    %9 = arith.addf %6, %8 : vector<8x128xf32>
    %c0_12 = arith.constant 0 : index
    %c0_13 = arith.constant 0 : index
    %10 = vector.load %arg1[%c0_12, %c0_13] : memref<8x128xbf16, #tpu.memory_space<vmem>>, vector<8x128xbf16>
    %11 = arith.extf %10 : vector<8x128xbf16> to vector<8x128xf32>
    %12 = arith.addf %9, %11 : vector<8x128xf32>
    %cst_14 = arith.constant 0.000000e+00 : f32
    %13 = vector.broadcast %cst_14 : f32 to vector<8x128xf32>
    %14 = arith.maximumf %12, %13 : vector<8x128xf32>
    %15 = arith.mulf %14, %14 : vector<8x128xf32>
    %cst_15 = arith.constant dense<0.000000e+00> : vector<8xf32>
    %16 = vector.multi_reduction <add>, %15, %cst_15 [1] : vector<8x128xf32> to vector<8xf32>
    %17 = vector.shape_cast %16 : vector<8xf32> to vector<8x1xf32>
    %cst_16 = arith.constant 1.000000e-24 : f32
    %18 = vector.broadcast %cst_16 : f32 to vector<8x1xf32>
    %19 = arith.maximumf %17, %18 : vector<8x1xf32>
    %20 = math.rsqrt %19 : vector<8x1xf32>
    %21 = vector.broadcast %20 : vector<8x1xf32> to vector<8x128xf32>
    %22 = arith.mulf %14, %21 : vector<8x128xf32>
    %c0_17 = arith.constant 0 : index
    %c0_18 = arith.constant 0 : index
    %23 = vector.load %arg5[%c0_17, %c0_18] : memref<8x128xf32, #tpu.memory_space<vmem>>, vector<8x128xf32>
    tpu.vector_store %arg5[%c0_17, %c0_18], %22 {strides = array<i32>} : memref<8x128xf32, #tpu.memory_space<vmem>>, vector<8x128xf32>,
    return
  }
  func.func @transform_0(%arg0: i32) -> (i32, i32) {
    %c0_i32 = arith.constant 0 : i32
    %c0_i32_0 = arith.constant 0 : i32
    return %arg0, %c0_i32 : i32, i32
  }
  func.func @transform_1(%arg0: i32) -> (i32, i32) {
    %c0_i32 = arith.constant 0 : i32
    %c0_i32_0 = arith.constant 0 : i32
    return %arg0, %c0_i32 : i32, i32
  }
  func.func @transform_2(%arg0: i32) -> (i32, i32) {
    %c0_i32 = arith.constant 0 : i32
    %c0_i32_0 = arith.constant 0 : i32
    %c0_i32_1 = arith.constant 0 : i32
    return %c0_i32, %c0_i32_0 : i32, i32
  }
  func.func @transform_3(%arg0: i32) -> (i32, i32) {
    %c0_i32 = arith.constant 0 : i32
    %c0_i32_0 = arith.constant 0 : i32
    %c0_i32_1 = arith.constant 0 : i32
    return %c0_i32, %c0_i32_0 : i32, i32
  }
  func.func @transform_4(%arg0: i32) -> (i32, i32) {
    %c0_i32 = arith.constant 0 : i32
    %c0_i32_0 = arith.constant 0 : i32
    return %arg0, %c0_i32 : i32, i32
  }
}

</mosaic_0001>

<bundles_post_ra>
// kernel: tpu_custom_call.1
= control target key start
LH: loop header
LB: loop body
LE: loop exit
PB: predicated region body
PF: predicated region fallthrough
CT: control target
= control target key end

     0   :  { %9 = vsyncpa [#allocation4], 0  ;;  %s506_s0 = inlined_call_operand.hbm [shape: bf16[8,128], index: 0, kind: input, shape index: {}]   ;;  %s507_s1 = inlined_call_operand.hbm [shape: bf16[8,128], index: 1, kind: input, shape index: {}]   ;;  %s508_s2 = inlined_call_operand.hbm [shape: bf16[256,128], index: 2, kind: input, shape index: {}]   ;;  %s509_s3 = inlined_call_operand.vmem [shape: f32[1,128], index: 3, kind: input, shape index: {}]   ;;  %s510_s4 = inlined_call_operand.hbm [shape: f32[8,128], index: 4, kind: output, shape index: {}]  }
   0x1   :  { %10 = vsyncpa [#allocation7], 0  ;;  %s28_s17 = sshll.u32 %s507_s1, 4  ;;  %s29_s17 = int_to_ptr.hbm [resolvable:$true] %s28_s17 }
   0x2   :  { %11 = vsyncpa [#allocation5], 0  ;;  %s460_s18 = smov [#allocation6]   ;;  %s17_s22 = sshll.u32 %s506_s0, 4  ;;  %s18_s22 = int_to_ptr.hbm [resolvable:$true] %s17_s22 }
   0x3   :  { %s30_s19 = sshll.u32 %s460_s18, 4  ;;  %s461_s23 = smov [#allocation3]   ;;  %s31_s19 = int_to_ptr.vmem [resolvable:$true] %s30_s19 }
   0x4   :  { %33 = dma.hbm_to_vmem [thread:$0]  %s29_s17, 64, %s31_s19, [#allocation7]  }
   0x5   :  { %s19_s24 = sshll.u32 %s461_s23, 4  ;;  %s38_s27 = sshll.u32 %s508_s2, 4  ;;  %s20_s24 = int_to_ptr.vmem [resolvable:$true] %s19_s24  ;;  %s39_s27 = int_to_ptr.hbm [resolvable:$true] %s38_s27 }
   0x6   :  { %22 = dma.hbm_to_vmem [thread:$0]  %s18_s22, 64, %s20_s24, [#allocation4]  }
   0x7   :  { %s462_s1 = smov [#allocation8]   ;;  %s463_s29 = smov 64  }
   0x8   :  { %s40_s28 = sshll.u32 %s462_s1, 4  ;;  %s464_s30 = smov 4   ;;  %s41_s28 = int_to_ptr.vmem [resolvable:$true] %s40_s28 }
   0x9   :  { %46 = dma.hbm_to_vmem [thread:$0]  %s39_s27, 2048, %s41_s28, [#allocation7], %s463_s29, %s463_s29, %s464_s30  }
   0xa   :  { %454 = dma.done.wait [#allocation4], 64  }
   0xb   :  { %455 = vsyncadd [#allocation4], 4294967232 }
   0xc   :  { %456 = dma.done.wait [#allocation7], 2112  }
   0xd   :  { %457 = vsyncadd [#allocation7], 4294965184  ;;  %v340_v0 = vld [vmem:[#allocation8 + $0x38] sm:$0xff]  ;;  %v339_v2 = vld [vmem:[#allocation8 + $0x30] sm:$0xff]  ;;  %s258_s8 = sshll.u32 %s510_s4, 4  ;;  %s259_s8 = int_to_ptr.hbm [resolvable:$true] %s258_s8 }
   0xe   :  { %v348_v1 = vld [vmem:[#allocation8 + $0x78] sm:$0xff]  ;;  %205 = vmatpush.bf16.msra.mxu0 %v340_v0  ;;  %v347_v3 = vld [vmem:[#allocation8 + $0x70] sm:$0xff]  ;;  %v338_v6 = vld [vmem:[#allocation8 + $0x28] sm:$0xff] }
   0xf   :  { %218 = vmatpush.bf16.msra.mxu1 %v348_v1  ;;  %v61_v4 = vld [vmem:[#allocation3] sm:$0xf]  ;;  %v63_v5 = vld [vmem:[#allocation6] sm:$0xf]  ;;  %v346_v7 = vld [vmem:[#allocation8 + $0x68] sm:$0xff] }
  0x10   :  { %62 = vst [vmem:[#allocation2] sm:$0xf] %v61_v4  ;;  %v337_v8 = vld [vmem:[#allocation8 + $0x20] sm:$0xff]  ;;  %v336_v10 = vld [vmem:[#allocation8 + $0x18] sm:$0xff]  ;;  %v335_v12 = vld [vmem:[#allocation8 + $0x10] sm:$0xff] }
  0x11   :  { %64 = vst [vmem:[#allocation2 + $0x4] sm:$0xf] %v63_v5  ;;  %v345_v9 = vld [vmem:[#allocation8 + $0x60] sm:$0xff]  ;;  %v344_v11 = vld [vmem:[#allocation8 + $0x58] sm:$0xff]  ;;  %v343_v13 = vld [vmem:[#allocation8 + $0x50] sm:$0xff] }
  0x12   :  { %206 = vmatpush.bf16.msra.mxu0 %v339_v2  ;;  %v334_v14 = vld [vmem:[#allocation8 + $0x8] sm:$0xff]  ;;  %v333_v19 = vld [vmem:[#allocation8] sm:$0xff]  ;;  %v355_v23 = vld [vmem:[%s509_s3] ss:$0 sm:$0xff]  ;;  %s465_s3 = smov [#allocation9]  }
  0x13   :  { %219 = vmatpush.bf16.msra.mxu1 %v347_v3  ;;  %v342_v15 = vld [vmem:[#allocation8 + $0x48] sm:$0xff]  ;;  %v341_v20 = vld [vmem:[#allocation8 + $0x40] sm:$0xff]  ;;  %v231_v24 = vld [vmem:[#allocation3] sm:$0xf]  ;;  %s256_s5 = sshll.u32 %s465_s3, 4  ;;  %s257_s5 = int_to_ptr.vmem [resolvable:$true] %s256_s5 }
  0x14   :  { %v232_v28 = vunpack.c.l.bf16 %v231_v24 }
  0x16   :  { %207 = vmatpush.bf16.msra.mxu0 %v338_v6 }
  0x17   :  { %220 = vmatpush.bf16.msra.mxu1 %v346_v7 }
  0x18   :  { %v65_v16 = vld [vmem:[#allocation2] sm:$0xff] }
  0x19   :  { %v103_v17 = vunpack.c.l.b16 %v65_v16  ;;  %v104_v18 = vunpack.c.h.b16 %v65_v16 }
  0x1a   :  { %208 = vmatpush.bf16.msra.mxu0 %v337_v8 }
  0x1b   :  { %221 = vmatpush.bf16.msra.mxu1 %v345_v9  ;;  %v105_v21 = vpack.c.b16 %v103_v17, %v103_v17  ;;  %v106_v22 = vpack.c.b16 %v104_v18, %v104_v18 }
  0x1e   :  { %209 = vmatpush.bf16.msra.mxu0 %v336_v10 }
  0x1f   :  { %222 = vmatpush.bf16.msra.mxu1 %v344_v11 }
  0x22   :  { %210 = vmatpush.bf16.msra.mxu0 %v335_v12 }
  0x23   :  { %223 = vmatpush.bf16.msra.mxu1 %v343_v13 }
  0x26   :  { %211 = vmatpush.bf16.msra.mxu0 %v334_v14 }
  0x27   :  { %224 = vmatpush.bf16.msra.mxu1 %v342_v15 }
  0x2a   :  { %212 = vmatpush.bf16.msra.mxu0 %v333_v19 }
  0x2b   :  { %225 = vmatpush.bf16.msra.mxu1 %v341_v20 }
  0x2d   :  { %213 = vmatmul.bf16.vlgmr.msra.gmra.mxu0 %v105_v21 }
  0x2e   :  { %226 = vmatmul.bf16.vlgmr.msra.gmra.mxu1 %v106_v22 }
  0xaa   :  { %v214_v25 = vpop.f32.mrf.mxu0 }
  0xab   :  { %v227_v26 = vpop.f32.mrf.mxu1  ;;  %v215_v27 = vadd.f32 %v355_v23, %v214_v25 }
  0xad   :  { %v228_v29 = vadd.f32 %v227_v26, %v215_v27 }
  0xaf   :  { %v233_v30 = vadd.f32 %v232_v28, %v228_v29 }
  0xb1   :  { %v234_v31 = vmax.f32 %v233_v30, 0.0 }
  0xb2   :  { %v216_v32 = vpop.f32.mrf.mxu0 }
  0xb3   :  { %v229_v33 = vpop.f32.mrf.mxu1  ;;  %v235_v34 = vmul.f32 %v234_v31, %v234_v31 }
  0xb5   :  { %236 = vadd.xlane.f32.xlu0 %v235_v34 }
 0x128   :  { %v237_v35 = vpop.xlane.xlu0 %236 }
 0x129   :  { %v238_v36 = vmax.f32 %v237_v35, 1e-24 }
 0x12b   :  { %356 = vrsqrt.f32 %v238_v36  ;;  %vm245_vm1 = vweird.f32 %v238_v36 }
 0x131   :  { %v357_v37 = vpop.eup %356 }
 0x132   :  { %v240_v38 = vmul.f32 %v357_v37, %v238_v36  ;;  %vm246_vm0 = vweird.f32 %v357_v37 }
 0x133   :  { %vm247_vm2 = vmor %vm245_vm1, %vm246_vm0 }
 0x134   :  { %v241_v39 = vmul.f32 %v357_v37, %v240_v38 }
 0x136   :  { %v242_v40 = vmul.f32 0.5, %v241_v39 }
 0x138   :  { %v243_v41 = vsub.f32 1.5, %v242_v40 }
 0x13a   :  { %v244_v42 = vmul.f32 %v357_v37, %v243_v41 }
 0x13c   :  { %v248_v43 = vsel %vm247_vm2, %v357_v37, %v244_v42 }
 0x13d   :  { %v249_v44 = vmul.f32 %v248_v43, %v234_v31 }
 0x13f   :  { %250 = vst [vmem:[#allocation9] sm:$0xff] %v249_v44 }
 0x140   :  { %261 = dma.vmem_to_hbm [thread:$0]  %s257_s5, 128, %s259_s8, [#allocation5]  }
 0x141   :  { %458 = dma.done.wait [#allocation5], 128  }
 0x142   :  { %459 = vsyncadd [#allocation5], 4294967168 }
 0x143   :  { %266 = vsyncpa [#allocation4], 1 }
 0x144   :  { %267 = vsyncpa [#allocation7], 1 }
 0x145   :  { %268 = vsyncpa [#allocation5], 1 }

</bundles_post_ra>
